<compile_context>
chip_gen: v7x
topology: tpu7x:2x2x1
jax: 0.10.0
libtpu: 0.0.40
codegen_flags: <defaults>
</compile_context>

<pallas_src>
import functools
import math

import jax
import jax.numpy as jnp
from jax import lax
from jax.experimental import pallas as pl
from jax.experimental.pallas import tpu as pltpu


def transformer_block_kernel(
    x_ref,                      # (1, S, E)   activations (f32)
    wq_ref, wk_ref, wv_ref,     # (H, E, hd)  head-major projections (bf16)
    wo_ref,                     # (H, hd, E)  output projection (bf16)
    bo_ref,                     # (1, E)      f32
    w1_ref, b1_ref,             # (E, FF) bf16 / (1, FF) f32
    w2_ref, b2_ref,             # (FF, E) bf16 / (1, E) f32
    ln1w_ref, ln1b_ref,         # (1, E) f32
    ln2w_ref, ln2b_ref,         # (1, E) f32
    o_ref,                      # (1, TQ, E)
    q_scratch, k_scratch, v_scratch,   # (H, S, hd) bf16 VMEM (persist over q tiles)
    *, nheads, q_tile):
    S, E = x_ref.shape[1], x_ref.shape[2]
    H = nheads
    hd = E // H
    TQ = q_tile
    scale = 1.0 / math.sqrt(hd)
    qi = pl.program_id(1)

    # ---- Q/K/V projection: once per batch row, kept resident in VMEM -------
    @pl.when(qi == 0)
    def _():
        xb = x_ref[0].astype(jnp.bfloat16)                   # (S, E)
        xh = jnp.broadcast_to(xb[None], (H, S, E))           # one broadcast, reused 3x
        q = jnp.einsum('hse,hed->hsd', xh, wq_ref[...],
                       preferred_element_type=jnp.float32)
        k = jnp.einsum('hse,hed->hsd', xh, wk_ref[...],
                       preferred_element_type=jnp.float32)
        v = jnp.einsum('hse,hed->hsd', xh, wv_ref[...],
                       preferred_element_type=jnp.float32)
        q_scratch[...] = (q * scale).astype(jnp.bfloat16)    # pre-scaled by 1/sqrt(hd)
        k_scratch[...] = k.astype(jnp.bfloat16)
        v_scratch[...] = v.astype(jnp.bfloat16)

    # ---- this query tile ----------------------------------------------------
    q_start = pl.multiple_of(qi * TQ, TQ)
    x_q = x_ref[0, pl.ds(q_start, TQ), :]                    # (TQ, E) f32 residual
    qh = q_scratch[:, pl.ds(q_start, TQ), :]                 # (H, TQ, hd) bf16

    # ---- scores, causal mask, softmax (all elementwise math in f32) --------
    s = jnp.einsum('hqd,hkd->hqk', qh, k_scratch[...],
                   preferred_element_type=jnp.float32)       # (H, TQ, S)
    row = q_start + lax.broadcasted_iota(jnp.int32, (TQ, S), 0)
    col = lax.broadcasted_iota(jnp.int32, (TQ, S), 1)
    s = jnp.where((col <= row)[None, :, :], s, -jnp.inf)
    m = jnp.max(s, axis=-1, keepdims=True)
    p = jnp.exp(s - m)
    p = p * pl.reciprocal(jnp.sum(p, axis=-1, keepdims=True), approx=True)

    o16 = jnp.einsum('hqk,hkd->hqd', p.astype(jnp.bfloat16), v_scratch[...],
                     preferred_element_type=jnp.float32).astype(jnp.bfloat16)

    # ---- output projection: accumulate per head (leading-dim slices only) --
    attn = jnp.broadcast_to(bo_ref[...], (TQ, E))            # start from bias (f32)
    for h in range(H):
        attn = attn + jnp.dot(o16[h], wo_ref[h],
                              preferred_element_type=jnp.float32)

    def layernorm(z, w, b, eps=1e-5):
        mu = jnp.mean(z, axis=-1, keepdims=True)
        var = jnp.mean(jnp.square(z - mu), axis=-1, keepdims=True)
        return (z - mu) * lax.rsqrt(var + eps) * w + b

    # residual 1 + LayerNorm 1 (dropout == identity in eval mode)
    n1 = layernorm(attn + x_q, ln1w_ref[...], ln1b_ref[...])

    # ---- feedforward --------------------------------------------------------
    h1 = jnp.dot(n1.astype(jnp.bfloat16), w1_ref[...],
                 preferred_element_type=jnp.float32) + b1_ref[...]
    h1 = jnp.maximum(h1, 0.0)
    ff = jnp.dot(h1.astype(jnp.bfloat16), w2_ref[...],
                 preferred_element_type=jnp.float32) + b2_ref[...]

    # residual 2 + LayerNorm 2
    n2 = layernorm(ff + n1, ln2w_ref[...], ln2b_ref[...])
    o_ref[0] = n2.astype(o_ref.dtype)


def transformer_block(x, params, nheads, q_tile=None):
    B, S, E = x.shape
    H = nheads
    assert E % H == 0
    hd = E // H
    FF = params["w1_t"].shape[1]
    if q_tile is None:
        q_tile = S if S <= 128 else 128
    assert S % q_tile == 0
    TQ = q_tile
    nq = S // TQ

    # Repack interleaved per-head [q|k|v] columns into head-major slabs and
    # cast matmul weights to bf16 (MXU-native; f32 accumulation in-kernel).
    wqkv = params["wqkv_t"].reshape(E, H, 3, hd)
    wq = jnp.transpose(wqkv[:, :, 0, :], (1, 0, 2)).astype(jnp.bfloat16)  # (H,E,hd)
    wk = jnp.transpose(wqkv[:, :, 1, :], (1, 0, 2)).astype(jnp.bfloat16)
    wv = jnp.transpose(wqkv[:, :, 2, :], (1, 0, 2)).astype(jnp.bfloat16)
    wo = params["wo_t"].reshape(H, hd, E).astype(jnp.bfloat16)            # (H,hd,E)
    w1 = params["w1_t"].astype(jnp.bfloat16)
    w2 = params["w2_t"].astype(jnp.bfloat16)

    def const(shape):
        return pl.BlockSpec(shape, lambda b, q, _n=len(shape): (0,) * _n)

    kernel = functools.partial(transformer_block_kernel, nheads=H, q_tile=TQ)
    return pl.pallas_call(
        kernel,
        out_shape=jax.ShapeDtypeStruct((B, S, E), x.dtype),
        grid=(B, nq),
        in_specs=[
            pl.BlockSpec((1, S, E), lambda b, q: (b, 0, 0)),   # x (full seq per batch)
            const((H, E, hd)), const((H, E, hd)), const((H, E, hd)),  # wq, wk, wv
            const((H, hd, E)), const((1, E)),                  # wo, bo
            const((E, FF)), const((1, FF)),                    # w1, b1
            const((FF, E)), const((1, E)),                     # w2, b2
            const((1, E)), const((1, E)),                      # ln1 w, b
            const((1, E)), const((1, E)),                      # ln2 w, b
        ],
        out_specs=pl.BlockSpec((1, TQ, E), lambda b, q: (b, q, 0)),
        scratch_shapes=[
            pltpu.VMEM((H, S, hd), jnp.bfloat16),   # Q (pre-scaled)
            pltpu.VMEM((H, S, hd), jnp.bfloat16),   # K
            pltpu.VMEM((H, S, hd), jnp.bfloat16),   # V
        ],
        compiler_params=pltpu.CompilerParams(
            dimension_semantics=("parallel", "arbitrary"),
            vmem_limit_bytes=32 * 1024 * 1024,
        ),
    )(x, wq, wk, wv, wo, params["bo"],
      w1, params["b1"], w2, params["b2"],
      params["ln1_w"], params["ln1_b"], params["ln2_w"], params["ln2_b"])


def reference(x, p, nheads):
    """Pure-JAX mirror of the PyTorch forward (eval-mode dropout), f32."""
    B, S, E = x.shape
    hd = E // nheads
    qkv = x @ p["wqkv_t"]
    qkv = qkv.reshape(B, S, nheads, 3 * hd).transpose(0, 2, 1, 3)
    q, k, v = jnp.split(qkv, 3, axis=-1)
    w = jnp.einsum("bhqd,bhkd->bhqk", q, k) / math.sqrt(hd)
    maskmat = jnp.tril(jnp.ones((S, S))) == 0.0
    w = jnp.where(maskmat, -jnp.inf, w)
    w = jax.nn.softmax(w, axis=-1)
    out = jnp.einsum("bhqk,bhkd->bhqd", w, v).transpose(0, 2, 1, 3).reshape(B, S, E)
    att = out @ p["wo_t"] + p["bo"]

    def ln(z, wt, b):
        mu = z.mean(-1, keepdims=True)
        var = ((z - mu) ** 2).mean(-1, keepdims=True)
        return (z - mu) / jnp.sqrt(var + 1e-5) * wt + b

    n1 = ln(att + x, p["ln1_w"], p["ln1_b"])
    ff = jax.nn.relu(n1 @ p["w1_t"] + p["b1"]) @ p["w2_t"] + p["b2"]
    return ln(ff + n1, p["ln2_w"], p["ln2_b"])


def make_params(key, emb, ff_hidden):
    ks = jax.random.split(key, 12)
    s = 0.1
    return {
        "wqkv_t": jax.random.normal(ks[0], (emb, 3 * emb), jnp.float32) * s,
        "wo_t":   jax.random.normal(ks[1], (emb, emb), jnp.float32) * s,
        "bo":     jax.random.normal(ks[2], (1, emb), jnp.float32) * s,
        "w1_t":   jax.random.normal(ks[3], (emb, ff_hidden), jnp.float32) * s,
        "b1":     jax.random.normal(ks[4], (1, ff_hidden), jnp.float32) * s,
        "w2_t":   jax.random.normal(ks[5], (ff_hidden, emb), jnp.float32) * s,
        "b2":     jax.random.normal(ks[6], (1, emb), jnp.float32) * s,
        "ln1_w":  1.0 + jax.random.normal(ks[7], (1, emb), jnp.float32) * s,
        "ln1_b":  jax.random.normal(ks[8], (1, emb), jnp.float32) * s,
        "ln2_w":  1.0 + jax.random.normal(ks[9], (1, emb), jnp.float32) * s,
        "ln2_b":  jax.random.normal(ks[10], (1, emb), jnp.float32) * s,
    }


if __name__ == "__main__":
    B, S, E, H, FF = 2, 8, 32, 4, 64   # emb_size=32, nheads=4, ff_hidden=64

    key = jax.random.PRNGKey(0)
    kx, kp = jax.random.split(key)
    x = jax.random.normal(kx, (B, S, E), jnp.float32)
    params = make_params(kp, E, FF)

    out = jax.block_until_ready(transformer_block(x, params, nheads=H))
    ref = reference(x, params, nheads=H)
    assert out.shape == (B, S, E)
    # bf16 MXU operands (+ approx reciprocal) => looser tolerance than pure f32.
    err = float(jnp.max(jnp.abs(out - ref)))
    assert err < 3e-2, f"mismatch vs. reference: max abs err {err}"

    print("KERNEL_OK")
</pallas_src>

<mosaic_0001>
module attributes {stable_mosaic.version = 11 : i64} {
  func.func @transformer_block_kernel(%arg0: i32, %arg1: i32, %arg2: memref<1x8x32xf32, #tpu.memory_space<vmem>>, %arg3: memref<4x32x8xbf16, #tpu.memory_space<vmem>>, %arg4: memref<4x32x8xbf16, #tpu.memory_space<vmem>>, %arg5: memref<4x32x8xbf16, #tpu.memory_space<vmem>>, %arg6: memref<4x8x32xbf16, #tpu.memory_space<vmem>>, %arg7: memref<1x32xf32, #tpu.memory_space<vmem>>, %arg8: memref<32x64xbf16, #tpu.memory_space<vmem>>, %arg9: memref<1x64xf32, #tpu.memory_space<vmem>>, %arg10: memref<64x32xbf16, #tpu.memory_space<vmem>>, %arg11: memref<1x32xf32, #tpu.memory_space<vmem>>, %arg12: memref<1x32xf32, #tpu.memory_space<vmem>>, %arg13: memref<1x32xf32, #tpu.memory_space<vmem>>, %arg14: memref<1x32xf32, #tpu.memory_space<vmem>>, %arg15: memref<1x32xf32, #tpu.memory_space<vmem>>, %arg16: memref<1x8x32xf32, #tpu.memory_space<vmem>>, %arg17: memref<4x8x8xbf16, #tpu.memory_space<vmem>>, %arg18: memref<4x8x8xbf16, #tpu.memory_space<vmem>>, %arg19: memref<4x8x8xbf16, #tpu.memory_space<vmem>>) attributes {dimension_semantics = [#tpu.dimension_semantics<parallel>, #tpu.dimension_semantics<arbitrary>], iteration_bounds = array<i64: 2, 1>, scalar_prefetch = 0 : i64, scratch_operands = 3 : i64, tpu.core_type = #tpu.core_type<tc>, window_params = [{transform_indices = @transform_0, window_bounds = array<i64: 1, 8, 32>}, {pipeline_mode = #tpu.pipeline_mode<synchronous>, transform_indices = @transform_1, window_bounds = array<i64: 4, 32, 8>}, {pipeline_mode = #tpu.pipeline_mode<synchronous>, transform_indices = @transform_2, window_bounds = array<i64: 4, 32, 8>}, {pipeline_mode = #tpu.pipeline_mode<synchronous>, transform_indices = @transform_3, window_bounds = array<i64: 4, 32, 8>}, {pipeline_mode = #tpu.pipeline_mode<synchronous>, transform_indices = @transform_4, window_bounds = array<i64: 4, 8, 32>}, {pipeline_mode = #tpu.pipeline_mode<synchronous>, transform_indices = @transform_5, window_bounds = array<i64: 1, 32>}, {pipeline_mode = #tpu.pipeline_mode<synchronous>, transform_indices = @transform_6, window_bounds = array<i64: 32, 64>}, {pipeline_mode = #tpu.pipeline_mode<synchronous>, transform_indices = @transform_7, window_bounds = array<i64: 1, 64>}, {pipeline_mode = #tpu.pipeline_mode<synchronous>, transform_indices = @transform_8, window_bounds = array<i64: 64, 32>}, {pipeline_mode = #tpu.pipeline_mode<synchronous>, transform_indices = @transform_9, window_bounds = array<i64: 1, 32>}, {pipeline_mode = #tpu.pipeline_mode<synchronous>, transform_indices = @transform_10, window_bounds = array<i64: 1, 32>}, {pipeline_mode = #tpu.pipeline_mode<synchronous>, transform_indices = @transform_11, window_bounds = array<i64: 1, 32>}, {pipeline_mode = #tpu.pipeline_mode<synchronous>, transform_indices = @transform_12, window_bounds = array<i64: 1, 32>}, {pipeline_mode = #tpu.pipeline_mode<synchronous>, transform_indices = @transform_13, window_bounds = array<i64: 1, 32>}, {transform_indices = @transform_14, window_bounds = array<i64: 1, 8, 32>}]} {
    %c0_i32 = arith.constant 0 : i32
    %0 = arith.cmpi eq, %arg1, %c0_i32 : i32
    %1 = arith.extui %0 : i1 to i32
    %c0_i32_0 = arith.constant 0 : i32
    %2 = arith.cmpi ne, %1, %c0_i32_0 : i32
    scf.if %2 {
      %c0_61 = arith.constant 0 : index
      %c0_62 = arith.constant 0 : index
      %c0_63 = arith.constant 0 : index
      %130 = vector.load %arg2[%c0_61, %c0_62, %c0_63] : memref<1x8x32xf32, #tpu.memory_space<vmem>>, vector<1x8x32xf32>
      %131 = vector.shape_cast %130 : vector<1x8x32xf32> to vector<8x32xf32>
      %132 = arith.truncf %131 : vector<8x32xf32> to vector<8x32xbf16>
      %133 = vector.shape_cast %132 : vector<8x32xbf16> to vector<1x8x32xbf16>
      %134 = vector.shape_cast %133 : vector<1x8x32xbf16> to vector<1x8x32xbf16>
      %135 = vector.broadcast %134 : vector<1x8x32xbf16> to vector<4x8x32xbf16>
      %c0_64 = arith.constant 0 : index
      %c0_65 = arith.constant 0 : index
      %c0_66 = arith.constant 0 : index
      %136 = vector.load %arg3[%c0_64, %c0_65, %c0_66] : memref<4x32x8xbf16, #tpu.memory_space<vmem>>, vector<4x32x8xbf16>
      "tpu.trace_start"() <{level = 10 : i32, message = "hse,hed->hsd"}> : () -> ()
      %cst_67 = arith.constant dense<0.000000e+00> : vector<4x8x8xf32>
      %137 = tpu.matmul %135, %136, %cst_67 {dimension_numbers = #tpu.dot_dimension_numbers<[2], [1], [1], [2], [0, 0, 0, 1, 1, 2], [0], [0]>} : vector<4x8x32xbf16>, vector<4x32x8xbf16>, vector<4x8x8xf32> -> vector<4x8x8xf32>
      "tpu.trace_stop"() : () -> ()
      %c0_68 = arith.constant 0 : index
      %c0_69 = arith.constant 0 : index
      %c0_70 = arith.constant 0 : index
      %138 = vector.load %arg4[%c0_68, %c0_69, %c0_70] : memref<4x32x8xbf16, #tpu.memory_space<vmem>>, vector<4x32x8xbf16>
      "tpu.trace_start"() <{level = 10 : i32, message = "hse,hed->hsd"}> : () -> ()
      %cst_71 = arith.constant dense<0.000000e+00> : vector<4x8x8xf32>
      %139 = tpu.matmul %135, %138, %cst_71 {dimension_numbers = #tpu.dot_dimension_numbers<[2], [1], [1], [2], [0, 0, 0, 1, 1, 2], [0], [0]>} : vector<4x8x32xbf16>, vector<4x32x8xbf16>, vector<4x8x8xf32> -> vector<4x8x8xf32>
      "tpu.trace_stop"() : () -> ()
      %c0_72 = arith.constant 0 : index
      %c0_73 = arith.constant 0 : index
      %c0_74 = arith.constant 0 : index
      %140 = vector.load %arg5[%c0_72, %c0_73, %c0_74] : memref<4x32x8xbf16, #tpu.memory_space<vmem>>, vector<4x32x8xbf16>
      "tpu.trace_start"() <{level = 10 : i32, message = "hse,hed->hsd"}> : () -> ()
      %cst_75 = arith.constant dense<0.000000e+00> : vector<4x8x8xf32>
      %141 = tpu.matmul %135, %140, %cst_75 {dimension_numbers = #tpu.dot_dimension_numbers<[2], [1], [1], [2], [0, 0, 0, 1, 1, 2], [0], [0]>} : vector<4x8x32xbf16>, vector<4x32x8xbf16>, vector<4x8x8xf32> -> vector<4x8x8xf32>
      "tpu.trace_stop"() : () -> ()
      %cst_76 = arith.constant 0.353553385 : f32
      %142 = vector.broadcast %cst_76 : f32 to vector<4x8x8xf32>
      %143 = arith.mulf %137, %142 : vector<4x8x8xf32>
      %144 = arith.truncf %143 : vector<4x8x8xf32> to vector<4x8x8xbf16>
      %c0_77 = arith.constant 0 : index
      %c0_78 = arith.constant 0 : index
      %c0_79 = arith.constant 0 : index
      %145 = vector.load %arg17[%c0_77, %c0_78, %c0_79] : memref<4x8x8xbf16, #tpu.memory_space<vmem>>, vector<4x8x8xbf16>
      tpu.vector_store %arg17[%c0_77, %c0_78, %c0_79], %144 {strides = array<i32>} : memref<4x8x8xbf16, #tpu.memory_space<vmem>>, vector<4x8x8xbf16>,
      %146 = arith.truncf %139 : vector<4x8x8xf32> to vector<4x8x8xbf16>
      %c0_80 = arith.constant 0 : index
      %c0_81 = arith.constant 0 : index
      %c0_82 = arith.constant 0 : index
      %147 = vector.load %arg18[%c0_80, %c0_81, %c0_82] : memref<4x8x8xbf16, #tpu.memory_space<vmem>>, vector<4x8x8xbf16>
      tpu.vector_store %arg18[%c0_80, %c0_81, %c0_82], %146 {strides = array<i32>} : memref<4x8x8xbf16, #tpu.memory_space<vmem>>, vector<4x8x8xbf16>,
      %148 = arith.truncf %141 : vector<4x8x8xf32> to vector<4x8x8xbf16>
      %c0_83 = arith.constant 0 : index
      %c0_84 = arith.constant 0 : index
      %c0_85 = arith.constant 0 : index
      %149 = vector.load %arg19[%c0_83, %c0_84, %c0_85] : memref<4x8x8xbf16, #tpu.memory_space<vmem>>, vector<4x8x8xbf16>
      tpu.vector_store %arg19[%c0_83, %c0_84, %c0_85], %148 {strides = array<i32>} : memref<4x8x8xbf16, #tpu.memory_space<vmem>>, vector<4x8x8xbf16>,
    } else {
    }
    %c8_i32 = arith.constant 8 : i32
    %3 = arith.muli %arg1, %c8_i32 : i32
    %4 = tpu.assume_multiple %3, 8 : i32
    %c0 = arith.constant 0 : index
    %5 = arith.index_cast %4 : i32 to index
    %c0_1 = arith.constant 0 : index
    %6 = vector.load %arg2[%c0, %5, %c0_1] : memref<1x8x32xf32, #tpu.memory_space<vmem>>, vector<1x8x32xf32>
    %7 = vector.shape_cast %6 : vector<1x8x32xf32> to vector<8x32xf32>
    %c0_2 = arith.constant 0 : index
    %8 = arith.index_cast %4 : i32 to index
    %c0_3 = arith.constant 0 : index
    %9 = vector.load %arg17[%c0_2, %8, %c0_3] : memref<4x8x8xbf16, #tpu.memory_space<vmem>>, vector<4x8x8xbf16>
    %c0_4 = arith.constant 0 : index
    %c0_5 = arith.constant 0 : index
    %c0_6 = arith.constant 0 : index
    %10 = vector.load %arg18[%c0_4, %c0_5, %c0_6] : memref<4x8x8xbf16, #tpu.memory_space<vmem>>, vector<4x8x8xbf16>
    "tpu.trace_start"() <{level = 10 : i32, message = "hqd,hkd->hqk"}> : () -> ()
    %cst = arith.constant dense<0.000000e+00> : vector<4x8x8xf32>
    %11 = tpu.matmul %9, %10, %cst {dimension_numbers = #tpu.dot_dimension_numbers<[2], [2], [1], [1], [0, 0, 0, 1, 1, 1], [0], [0]>} : vector<4x8x8xbf16>, vector<4x8x8xbf16>, vector<4x8x8xf32> -> vector<4x8x8xf32>
    "tpu.trace_stop"() : () -> ()
    %12 = tpu.iota {dimensions = array<i32: 0>} : vector<8x8xi32>
    %13 = vector.broadcast %4 : i32 to vector<8x8xi32>
    %14 = arith.addi %13, %12 : vector<8x8xi32>
    %15 = tpu.iota {dimensions = array<i32: 1>} : vector<8x8xi32>
    %16 = arith.cmpi sle, %15, %14 : vector<8x8xi32>
    %17 = vector.shape_cast %16 : vector<8x8xi1> to vector<1x8x8xi1>
    %cst_7 = arith.constant 0xFF800000 : f32
    %18 = vector.shape_cast %17 : vector<1x8x8xi1> to vector<1x8x8xi1>
    %19 = vector.broadcast %18 : vector<1x8x8xi1> to vector<4x8x8xi1>
    %20 = vector.broadcast %cst_7 : f32 to vector<4x8x8xf32>
    %21 = arith.select %19, %11, %20 : vector<4x8x8xi1>, vector<4x8x8xf32>
    %cst_8 = arith.constant dense<0xFF800000> : vector<4x8xf32>
    %22 = vector.multi_reduction <maximumf>, %21, %cst_8 [2] : vector<4x8x8xf32> to vector<4x8xf32>
    %23 = vector.shape_cast %22 : vector<4x8xf32> to vector<4x8x1xf32>
    %24 = vector.broadcast %23 : vector<4x8x1xf32> to vector<4x8x8xf32>
    %25 = arith.subf %21, %24 : vector<4x8x8xf32>
    %26 = math.exp %25 : vector<4x8x8xf32>
    %cst_9 = arith.constant dense<0.000000e+00> : vector<4x8xf32>
    %27 = vector.multi_reduction <add>, %26, %cst_9 [2] : vector<4x8x8xf32> to vector<4x8xf32>
    %28 = vector.shape_cast %27 : vector<4x8xf32> to vector<4x8x1xf32>
    %29 = tpu.reciprocal %28 {approx = true} : vector<4x8x1xf32> -> vector<4x8x1xf32>
    %30 = vector.broadcast %29 : vector<4x8x1xf32> to vector<4x8x8xf32>
    %31 = arith.mulf %26, %30 : vector<4x8x8xf32>
    %32 = arith.truncf %31 : vector<4x8x8xf32> to vector<4x8x8xbf16>
    %c0_10 = arith.constant 0 : index
    %c0_11 = arith.constant 0 : index
    %c0_12 = arith.constant 0 : index
    %33 = vector.load %arg19[%c0_10, %c0_11, %c0_12] : memref<4x8x8xbf16, #tpu.memory_space<vmem>>, vector<4x8x8xbf16>
    "tpu.trace_start"() <{level = 10 : i32, message = "hqk,hkd->hqd"}> : () -> ()
    %cst_13 = arith.constant dense<0.000000e+00> : vector<4x8x8xf32>
    %34 = tpu.matmul %32, %33, %cst_13 {dimension_numbers = #tpu.dot_dimension_numbers<[2], [1], [1], [2], [0, 0, 0, 1, 1, 2], [0], [0]>} : vector<4x8x8xbf16>, vector<4x8x8xbf16>, vector<4x8x8xf32> -> vector<4x8x8xf32>
    "tpu.trace_stop"() : () -> ()
    %35 = arith.truncf %34 : vector<4x8x8xf32> to vector<4x8x8xbf16>
    %c0_14 = arith.constant 0 : index
    %c0_15 = arith.constant 0 : index
    %36 = vector.load %arg7[%c0_14, %c0_15] : memref<1x32xf32, #tpu.memory_space<vmem>>, vector<1x32xf32>
    %37 = vector.shape_cast %36 : vector<1x32xf32> to vector<1x32xf32>
    %38 = vector.broadcast %37 : vector<1x32xf32> to vector<8x32xf32>
    %39 = vector.extract_strided_slice %35 {offsets = [0, 0, 0], sizes = [1, 8, 8], strides = [1, 1, 1]} : vector<4x8x8xbf16> to vector<1x8x8xbf16>
    %40 = vector.shape_cast %39 : vector<1x8x8xbf16> to vector<8x8xbf16>
    %c0_16 = arith.constant 0 : index
    %c0_17 = arith.constant 0 : index
    %c0_18 = arith.constant 0 : index
    %41 = vector.load %arg6[%c0_16, %c0_17, %c0_18] : memref<4x8x32xbf16, #tpu.memory_space<vmem>>, vector<1x8x32xbf16>
    %42 = vector.shape_cast %41 : vector<1x8x32xbf16> to vector<8x32xbf16>
    %cst_19 = arith.constant dense<0.000000e+00> : vector<8x32xf32>
    %43 = tpu.matmul %40, %42, %cst_19 {dimension_numbers = #tpu.dot_dimension_numbers<[1], [0], [0], [1], [0, 0, 1, 1], [], []>} : vector<8x8xbf16>, vector<8x32xbf16>, vector<8x32xf32> -> vector<8x32xf32>
    %44 = arith.addf %38, %43 : vector<8x32xf32>
    %45 = vector.extract_strided_slice %35 {offsets = [1, 0, 0], sizes = [1, 8, 8], strides = [1, 1, 1]} : vector<4x8x8xbf16> to vector<1x8x8xbf16>
    %46 = vector.shape_cast %45 : vector<1x8x8xbf16> to vector<8x8xbf16>
    %c1 = arith.constant 1 : index
    %c0_20 = arith.constant 0 : index
    %c0_21 = arith.constant 0 : index
    %47 = vector.load %arg6[%c1, %c0_20, %c0_21] : memref<4x8x32xbf16, #tpu.memory_space<vmem>>, vector<1x8x32xbf16>
    %48 = vector.shape_cast %47 : vector<1x8x32xbf16> to vector<8x32xbf16>
    %cst_22 = arith.constant dense<0.000000e+00> : vector<8x32xf32>
    %49 = tpu.matmul %46, %48, %cst_22 {dimension_numbers = #tpu.dot_dimension_numbers<[1], [0], [0], [1], [0, 0, 1, 1], [], []>} : vector<8x8xbf16>, vector<8x32xbf16>, vector<8x32xf32> -> vector<8x32xf32>
    %50 = arith.addf %44, %49 : vector<8x32xf32>
    %51 = vector.extract_strided_slice %35 {offsets = [2, 0, 0], sizes = [1, 8, 8], strides = [1, 1, 1]} : vector<4x8x8xbf16> to vector<1x8x8xbf16>
    %52 = vector.shape_cast %51 : vector<1x8x8xbf16> to vector<8x8xbf16>
    %c2 = arith.constant 2 : index
    %c0_23 = arith.constant 0 : index
    %c0_24 = arith.constant 0 : index
    %53 = vector.load %arg6[%c2, %c0_23, %c0_24] : memref<4x8x32xbf16, #tpu.memory_space<vmem>>, vector<1x8x32xbf16>
    %54 = vector.shape_cast %53 : vector<1x8x32xbf16> to vector<8x32xbf16>
    %cst_25 = arith.constant dense<0.000000e+00> : vector<8x32xf32>
    %55 = tpu.matmul %52, %54, %cst_25 {dimension_numbers = #tpu.dot_dimension_numbers<[1], [0], [0], [1], [0, 0, 1, 1], [], []>} : vector<8x8xbf16>, vector<8x32xbf16>, vector<8x32xf32> -> vector<8x32xf32>
    %56 = arith.addf %50, %55 : vector<8x32xf32>
    %57 = vector.extract_strided_slice %35 {offsets = [3, 0, 0], sizes = [1, 8, 8], strides = [1, 1, 1]} : vector<4x8x8xbf16> to vector<1x8x8xbf16>
    %58 = vector.shape_cast %57 : vector<1x8x8xbf16> to vector<8x8xbf16>
    %c3 = arith.constant 3 : index
    %c0_26 = arith.constant 0 : index
    %c0_27 = arith.constant 0 : index
    %59 = vector.load %arg6[%c3, %c0_26, %c0_27] : memref<4x8x32xbf16, #tpu.memory_space<vmem>>, vector<1x8x32xbf16>
    %60 = vector.shape_cast %59 : vector<1x8x32xbf16> to vector<8x32xbf16>
    %cst_28 = arith.constant dense<0.000000e+00> : vector<8x32xf32>
    %61 = tpu.matmul %58, %60, %cst_28 {dimension_numbers = #tpu.dot_dimension_numbers<[1], [0], [0], [1], [0, 0, 1, 1], [], []>} : vector<8x8xbf16>, vector<8x32xbf16>, vector<8x32xf32> -> vector<8x32xf32>
    %62 = arith.addf %56, %61 : vector<8x32xf32>
    %63 = arith.addf %62, %7 : vector<8x32xf32>
    %c0_29 = arith.constant 0 : index
    %c0_30 = arith.constant 0 : index
    %64 = vector.load %arg12[%c0_29, %c0_30] : memref<1x32xf32, #tpu.memory_space<vmem>>, vector<1x32xf32>
    %c0_31 = arith.constant 0 : index
    %c0_32 = arith.constant 0 : index
    %65 = vector.load %arg13[%c0_31, %c0_32] : memref<1x32xf32, #tpu.memory_space<vmem>>, vector<1x32xf32>
    %cst_33 = arith.constant dense<0.000000e+00> : vector<8xf32>
    %66 = vector.multi_reduction <add>, %63, %cst_33 [1] : vector<8x32xf32> to vector<8xf32>
    %67 = vector.shape_cast %66 : vector<8xf32> to vector<8x1xf32>
    %cst_34 = arith.constant 3.200000e+01 : f32
    %68 = vector.broadcast %cst_34 : f32 to vector<8x1xf32>
    %69 = arith.divf %67, %68 : vector<8x1xf32>
    %70 = vector.broadcast %69 : vector<8x1xf32> to vector<8x32xf32>
    %71 = arith.subf %63, %70 : vector<8x32xf32>
    %72 = arith.mulf %71, %71 : vector<8x32xf32>
    %cst_35 = arith.constant dense<0.000000e+00> : vector<8xf32>
    %73 = vector.multi_reduction <add>, %72, %cst_35 [1] : vector<8x32xf32> to vector<8xf32>
    %74 = vector.shape_cast %73 : vector<8xf32> to vector<8x1xf32>
    %cst_36 = arith.constant 3.200000e+01 : f32
    %75 = vector.broadcast %cst_36 : f32 to vector<8x1xf32>
    %76 = arith.divf %74, %75 : vector<8x1xf32>
    %77 = vector.broadcast %69 : vector<8x1xf32> to vector<8x32xf32>
    %78 = arith.subf %63, %77 : vector<8x32xf32>
    %cst_37 = arith.constant 9.99999974E-6 : f32
    %79 = vector.broadcast %cst_37 : f32 to vector<8x1xf32>
    %80 = arith.addf %76, %79 : vector<8x1xf32>
    %81 = math.rsqrt %80 : vector<8x1xf32>
    %82 = vector.broadcast %81 : vector<8x1xf32> to vector<8x32xf32>
    %83 = arith.mulf %78, %82 : vector<8x32xf32>
    %84 = vector.broadcast %64 : vector<1x32xf32> to vector<8x32xf32>
    %85 = arith.mulf %83, %84 : vector<8x32xf32>
    %86 = vector.broadcast %65 : vector<1x32xf32> to vector<8x32xf32>
    %87 = arith.addf %85, %86 : vector<8x32xf32>
    %88 = arith.truncf %87 : vector<8x32xf32> to vector<8x32xbf16>
    %c0_38 = arith.constant 0 : index
    %c0_39 = arith.constant 0 : index
    %89 = vector.load %arg8[%c0_38, %c0_39] : memref<32x64xbf16, #tpu.memory_space<vmem>>, vector<32x64xbf16>
    %cst_40 = arith.constant dense<0.000000e+00> : vector<8x64xf32>
    %90 = tpu.matmul %88, %89, %cst_40 {dimension_numbers = #tpu.dot_dimension_numbers<[1], [0], [0], [1], [0, 0, 1, 1], [], []>} : vector<8x32xbf16>, vector<32x64xbf16>, vector<8x64xf32> -> vector<8x64xf32>
    %c0_41 = arith.constant 0 : index
    %c0_42 = arith.constant 0 : index
    %91 = vector.load %arg9[%c0_41, %c0_42] : memref<1x64xf32, #tpu.memory_space<vmem>>, vector<1x64xf32>
    %92 = vector.broadcast %91 : vector<1x64xf32> to vector<8x64xf32>
    %93 = arith.addf %90, %92 : vector<8x64xf32>
    %cst_43 = arith.constant 0.000000e+00 : f32
    %94 = vector.broadcast %cst_43 : f32 to vector<8x64xf32>
    %95 = arith.maximumf %93, %94 : vector<8x64xf32>
    %96 = arith.truncf %95 : vector<8x64xf32> to vector<8x64xbf16>
    %c0_44 = arith.constant 0 : index
    %c0_45 = arith.constant 0 : index
    %97 = vector.load %arg10[%c0_44, %c0_45] : memref<64x32xbf16, #tpu.memory_space<vmem>>, vector<64x32xbf16>
    %cst_46 = arith.constant dense<0.000000e+00> : vector<8x32xf32>
    %98 = tpu.matmul %96, %97, %cst_46 {dimension_numbers = #tpu.dot_dimension_numbers<[1], [0], [0], [1], [0, 0, 1, 1], [], []>} : vector<8x64xbf16>, vector<64x32xbf16>, vector<8x32xf32> -> vector<8x32xf32>
    %c0_47 = arith.constant 0 : index
    %c0_48 = arith.constant 0 : index
    %99 = vector.load %arg11[%c0_47, %c0_48] : memref<1x32xf32, #tpu.memory_space<vmem>>, vector<1x32xf32>
    %100 = vector.broadcast %99 : vector<1x32xf32> to vector<8x32xf32>
    %101 = arith.addf %98, %100 : vector<8x32xf32>
    %102 = arith.addf %101, %87 : vector<8x32xf32>
    %c0_49 = arith.constant 0 : index
    %c0_50 = arith.constant 0 : index
    %103 = vector.load %arg14[%c0_49, %c0_50] : memref<1x32xf32, #tpu.memory_space<vmem>>, vector<1x32xf32>
    %c0_51 = arith.constant 0 : index
    %c0_52 = arith.constant 0 : index
    %104 = vector.load %arg15[%c0_51, %c0_52] : memref<1x32xf32, #tpu.memory_space<vmem>>, vector<1x32xf32>
    %cst_53 = arith.constant dense<0.000000e+00> : vector<8xf32>
    %105 = vector.multi_reduction <add>, %102, %cst_53 [1] : vector<8x32xf32> to vector<8xf32>
    %106 = vector.shape_cast %105 : vector<8xf32> to vector<8x1xf32>
    %cst_54 = arith.constant 3.200000e+01 : f32
    %107 = vector.broadcast %cst_54 : f32 to vector<8x1xf32>
    %108 = arith.divf %106, %107 : vector<8x1xf32>
    %109 = vector.broadcast %108 : vector<8x1xf32> to vector<8x32xf32>
    %110 = arith.subf %102, %109 : vector<8x32xf32>
    %111 = arith.mulf %110, %110 : vector<8x32xf32>
    %cst_55 = arith.constant dense<0.000000e+00> : vector<8xf32>
    %112 = vector.multi_reduction <add>, %111, %cst_55 [1] : vector<8x32xf32> to vector<8xf32>
    %113 = vector.shape_cast %112 : vector<8xf32> to vector<8x1xf32>
    %cst_56 = arith.constant 3.200000e+01 : f32
    %114 = vector.broadcast %cst_56 : f32 to vector<8x1xf32>
    %115 = arith.divf %113, %114 : vector<8x1xf32>
    %116 = vector.broadcast %108 : vector<8x1xf32> to vector<8x32xf32>
    %117 = arith.subf %102, %116 : vector<8x32xf32>
    %cst_57 = arith.constant 9.99999974E-6 : f32
    %118 = vector.broadcast %cst_57 : f32 to vector<8x1xf32>
    %119 = arith.addf %115, %118 : vector<8x1xf32>
    %120 = math.rsqrt %119 : vector<8x1xf32>
    %121 = vector.broadcast %120 : vector<8x1xf32> to vector<8x32xf32>
    %122 = arith.mulf %117, %121 : vector<8x32xf32>
    %123 = vector.broadcast %103 : vector<1x32xf32> to vector<8x32xf32>
    %124 = arith.mulf %122, %123 : vector<8x32xf32>
    %125 = vector.broadcast %104 : vector<1x32xf32> to vector<8x32xf32>
    %126 = arith.addf %124, %125 : vector<8x32xf32>
    %c0_58 = arith.constant 0 : index
    %c0_59 = arith.constant 0 : index
    %c0_60 = arith.constant 0 : index
    %127 = vector.load %arg16[%c0_58, %c0_59, %c0_60] : memref<1x8x32xf32, #tpu.memory_space<vmem>>, vector<1x8x32xf32>
    %128 = vector.shape_cast %127 : vector<1x8x32xf32> to vector<8x32xf32>
    %129 = vector.shape_cast %126 : vector<8x32xf32> to vector<1x8x32xf32>
    tpu.vector_store %arg16[%c0_58, %c0_59, %c0_60], %129 {strides = array<i32>} : memref<1x8x32xf32, #tpu.memory_space<vmem>>, vector<1x8x32xf32>,
    return
  }
  func.func @transform_0(%arg0: i32, %arg1: i32) -> (i32, i32, i32) {
    %c0_i32 = arith.constant 0 : i32
    %c0_i32_0 = arith.constant 0 : i32
    %c0_i32_1 = arith.constant 0 : i32
    return %arg0, %c0_i32, %c0_i32_0 : i32, i32, i32
  }
  func.func @transform_1(%arg0: i32, %arg1: i32) -> (i32, i32, i32) {
    %c0_i32 = arith.constant 0 : i32
    %c0_i32_0 = arith.constant 0 : i32
    %c0_i32_1 = arith.constant 0 : i32
    %c0_i32_2 = arith.constant 0 : i32
    return %c0_i32, %c0_i32_0, %c0_i32_1 : i32, i32, i32
  }
  func.func @transform_2(%arg0: i32, %arg1: i32) -> (i32, i32, i32) {
    %c0_i32 = arith.constant 0 : i32
    %c0_i32_0 = arith.constant 0 : i32
    %c0_i32_1 = arith.constant 0 : i32
    %c0_i32_2 = arith.constant 0 : i32
    return %c0_i32, %c0_i32_0, %c0_i32_1 : i32, i32, i32
  }
  func.func @transform_3(%arg0: i32, %arg1: i32) -> (i32, i32, i32) {
    %c0_i32 = arith.constant 0 : i32
    %c0_i32_0 = arith.constant 0 : i32
    %c0_i32_1 = arith.constant 0 : i32
    %c0_i32_2 = arith.constant 0 : i32
    return %c0_i32, %c0_i32_0, %c0_i32_1 : i32, i32, i32
  }
  func.func @transform_4(%arg0: i32, %arg1: i32) -> (i32, i32, i32) {
    %c0_i32 = arith.constant 0 : i32
    %c0_i32_0 = arith.constant 0 : i32
    %c0_i32_1 = arith.constant 0 : i32
    %c0_i32_2 = arith.constant 0 : i32
    return %c0_i32, %c0_i32_0, %c0_i32_1 : i32, i32, i32
  }
  func.func @transform_5(%arg0: i32, %arg1: i32) -> (i32, i32) {
    %c0_i32 = arith.constant 0 : i32
    %c0_i32_0 = arith.constant 0 : i32
    %c0_i32_1 = arith.constant 0 : i32
    return %c0_i32, %c0_i32_0 : i32, i32
  }
  func.func @transform_6(%arg0: i32, %arg1: i32) -> (i32, i32) {
    %c0_i32 = arith.constant 0 : i32
    %c0_i32_0 = arith.constant 0 : i32
    %c0_i32_1 = arith.constant 0 : i32
    return %c0_i32, %c0_i32_0 : i32, i32
  }
  func.func @transform_7(%arg0: i32, %arg1: i32) -> (i32, i32) {
    %c0_i32 = arith.constant 0 : i32
    %c0_i32_0 = arith.constant 0 : i32
    %c0_i32_1 = arith.constant 0 : i32
    return %c0_i32, %c0_i32_0 : i32, i32
  }
  func.func @transform_8(%arg0: i32, %arg1: i32) -> (i32, i32) {
    %c0_i32 = arith.constant 0 : i32
    %c0_i32_0 = arith.constant 0 : i32
    %c0_i32_1 = arith.constant 0 : i32
    return %c0_i32, %c0_i32_0 : i32, i32
  }
  func.func @transform_9(%arg0: i32, %arg1: i32) -> (i32, i32) {
    %c0_i32 = arith.constant 0 : i32
    %c0_i32_0 = arith.constant 0 : i32
    %c0_i32_1 = arith.constant 0 : i32
    return %c0_i32, %c0_i32_0 : i32, i32
  }
  func.func @transform_10(%arg0: i32, %arg1: i32) -> (i32, i32) {
    %c0_i32 = arith.constant 0 : i32
    %c0_i32_0 = arith.constant 0 : i32
    %c0_i32_1 = arith.constant 0 : i32
    return %c0_i32, %c0_i32_0 : i32, i32
  }
  func.func @transform_11(%arg0: i32, %arg1: i32) -> (i32, i32) {
    %c0_i32 = arith.constant 0 : i32
    %c0_i32_0 = arith.constant 0 : i32
    %c0_i32_1 = arith.constant 0 : i32
    return %c0_i32, %c0_i32_0 : i32, i32
  }
  func.func @transform_12(%arg0: i32, %arg1: i32) -> (i32, i32) {
    %c0_i32 = arith.constant 0 : i32
    %c0_i32_0 = arith.constant 0 : i32
    %c0_i32_1 = arith.constant 0 : i32
    return %c0_i32, %c0_i32_0 : i32, i32
  }
  func.func @transform_13(%arg0: i32, %arg1: i32) -> (i32, i32) {
    %c0_i32 = arith.constant 0 : i32
    %c0_i32_0 = arith.constant 0 : i32
    %c0_i32_1 = arith.constant 0 : i32
    return %c0_i32, %c0_i32_0 : i32, i32
  }
  func.func @transform_14(%arg0: i32, %arg1: i32) -> (i32, i32, i32) {
    %c0_i32 = arith.constant 0 : i32
    %c0_i32_0 = arith.constant 0 : i32
    return %arg0, %arg1, %c0_i32 : i32, i32, i32
  }
}

</mosaic_0001>

<bundles_post_ra>
// kernel: tpu_custom_call.1
= control target key start
LH: loop header
LB: loop body
LE: loop exit
PB: predicated region body
PF: predicated region fallthrough
CT: control target
= control target key end

     0   :  { %s3159_s0 = inlined_call_operand.vmem [shape: f32[2,8,32], index: 0, kind: input, shape index: {}]   ;;  %s3160_s1 = inlined_call_operand.vmem [shape: bf16[4,32,8], index: 1, kind: input, shape index: {}]   ;;  %s3161_s2 = inlined_call_operand.vmem [shape: bf16[4,32,8], index: 2, kind: input, shape index: {}]   ;;  %s3162_s3 = inlined_call_operand.vmem [shape: bf16[4,32,8], index: 3, kind: input, shape index: {}]   ;;  %s3163_s4 = inlined_call_operand.vmem [shape: bf16[4,8,32], index: 4, kind: input, shape index: {}]   ;;  %s3164_s5 = inlined_call_operand.vmem [shape: f32[1,32], index: 5, kind: input, shape index: {}]   ;;  %s3165_s6 = inlined_call_operand.vmem [shape: bf16[32,64], index: 6, kind: input, shape index: {}]   ;;  %s3166_s7 = inlined_call_operand.vmem [shape: f32[1,64], index: 7, kind: input, shape index: {}]   ;;  %s3167_s8 = inlined_call_operand.vmem [shape: bf16[64,32], index: 8, kind: input, shape index: {}]   ;;  %s3168_s9 = inlined_call_operand.vmem [shape: f32[1,32], index: 9, kind: input, shape index: {}]   ;;  %s3169_s10 = inlined_call_operand.vmem [shape: f32[1,32], index: 10, kind: input, shape index: {}]   ;;  %s3170_s11 = inlined_call_operand.vmem [shape: f32[1,32], index: 11, kind: input, shape index: {}]   ;;  %s3171_s12 = inlined_call_operand.vmem [shape: f32[1,32], index: 12, kind: input, shape index: {}]   ;;  %s3172_s13 = inlined_call_operand.vmem [shape: f32[1,32], index: 13, kind: input, shape index: {}]   ;;  %s3173_s14 = inlined_call_operand.hbm [shape: f32[2,8,32], index: 14, kind: output, shape index: {}]  }
   0x1   :  { %3176 = sst [smem:[#allocation11_spill]] %s3159_s0 }
   0x2   :  { %3177 = sst [smem:[#allocation12_spill]] %s3160_s1 }
   0x3   :  { %3178 = sst [smem:[#allocation13_spill]] %s3161_s2 }
   0x4   :  { %19 = vsyncpa [#allocation6], 0 }
   0x5   :  { %21 = vsyncpa [#allocation6 + $0x1], 0  ;;  %s2745_s29 = smov 0   ;;  %s2747_s30 = smov 0  }
   0x6   :  { %s2749_s15 = smov 0   ;;  %s2751_s16 = smov 0  }
   0x7   :  { %s2753_s17 = smov 0   ;;  %s2755_s18 = smov 0  }
   0x8 LB: > { %3179 = sst [smem:[#allocation8_spill]] %s2661_s17  ;;  %s2147_s19 = sadd.s32 4294967295, %s2665_s18   ;;  %s2665_s18 = sphi %s2755_s18, %s27_s18   ;;  %s2661_s17 = sphi %s2753_s17, %s3189_s17   ;;  %s2657_s16 = sphi %s2751_s16, %s3188_s16   ;;  %s2653_s15 = sphi %s2749_s15, %s3192_s15   ;;  %s2649_s30 = sphi %s2747_s30, %s3191_s30   ;;  %s2645_s29 = sphi %s2745_s29, %s3190_s29  }
   0x9   : > { %s2148_s20 = sadd.s32 4294967294, %s2665_s18   ;;  %s39_s21 = sadd.s32 1, %s2661_s17 }
   0xa   : > { %s347_s22 = sadd.s32 1, %s2653_s15  ;;  %p41_p0 = scmp.ge.s32.totalorder %s39_s21, 2 }
   0xb   : > { %p357_p1 = scmp.ne.s32.totalorder %s2653_s15, %s2649_s30  ;;  %p358_p2 = scmp.eq.s32.totalorder %s2147_s19, 1 }
   0xc   : > { %p363_p3 = scmp.ne.s32.totalorder %s2649_s30, %s2645_s29  ;;  %s3194_s21 = smov (%p41_p0, %s39_s21), 0 }
   0xd   : > { %3180 = sst [smem:[#allocation9_spill]] %s3194_s21  ;;  %p2785_p4 = por %p358_p2, %p357_p1 }
   0xe   : > { %p364_p5 = scmp.eq.s32.totalorder %s2148_s20, 1  ;;  %s342_s24 = ssub.s32 %s2661_s17, %s3194_s21 }
   0xf   : > { %p2151_p6 = scmp.ge.s32.totalorder %s2665_s18, 1  ;;  %p345_p7 = scmp.eq.s32.totalorder %s342_s24, 0 }
  0x10   : > { %p2792_p8 = por %p364_p5, %p363_p3  ;;  %p428_p9 = scmp.lt.s32.totalorder %s2665_s18, 3 }
  0x11   : > { %s2798_s26 = scalar_select %p345_p7, %s2653_s15, %s347_s22  }
  0x12   : > { %p429_p10 = pnand %p2151_p6, %p428_p9 }
  0x13   : > { %3183 = sst [smem:[#allocation10_spill]] %s2798_s26  ;;  %s3184_s1 = sld [smem:[#allocation12_spill]] (!%p429_p10)  ;;  %v2667_v1 = vmov (!%p429_p10), 0.0   ;;  %vm2668_vm0 = vmmov (!%p429_p10), 0   ;;  %vm512_vm1 = vcmask (!%p429_p10), 261120   ;;  %v2553_v19 = vld [vmem:[%s3162_s3] sm:$0xff] (!%p429_p10)  }
  0x14   : > { %432 = sbr.rel (%p429_p10) target bundleno = 2328 (0x918), region = 76  ;;  %2292 = vmatprep.subr.bf16.mxu0 (!%p429_p10), %v2667_v1  ;;  %2300 = vmatprep.subr.bf16.mxu1 (!%p429_p10), %v2667_v1  ;;  %p473_p11 = scmp.lt.s32.totalorder (!%p429_p10), %s2657_s16, 1  ;;  %v2554_v20 = vld [vmem:[%s3162_s3 + $0x10] sm:$0xff] (!%p429_p10)   ;;  %v2555_v21 = vld [vmem:[%s3162_s3 + $0x8] sm:$0xff] (!%p429_p10)   ;;  %v2556_v22 = vld [vmem:[%s3162_s3 + $0x18] sm:$0xff] (!%p429_p10)   ;;  %vm1168_vm2 = vcmask (!%p429_p10), 60416  }
  0x15   : > { %2296 = vmatprep.mubr.msk.bf16.mxu0 (!%p429_p10), %vm2668_vm0, %v2667_v1  ;;  %2304 = vmatprep.mubr.msk.bf16.mxu1 (!%p429_p10), %vm2668_vm0, %v2667_v1  ;;  %s3185_s0 = sld [smem:[#allocation11_spill]] (!%p429_p10)  ;;  %s3186_s2 = sld [smem:[#allocation13_spill]] (!%p429_p10)  ;;  %v2557_v23 = vld [vmem:[%s3162_s3 + $0x20] sm:$0xff] (!%p429_p10)   ;;  %v2558_v24 = vld [vmem:[%s3162_s3 + $0x30] sm:$0xff] (!%p429_p10)   ;;  %v2559_v25 = vld [vmem:[%s3162_s3 + $0x28] sm:$0xff] (!%p429_p10)   ;;  %vm1204_vm3 = vcmask (!%p429_p10), 64512  }
  0x16   : > { %v2560_v26 = vld [vmem:[%s3162_s3 + $0x38] sm:$0xff] (!%p429_p10)   ;;  %vm1457_vm4 = vcmask (!%p429_p10), 1043456   ;;  %vm1985_vm6 = vcmask (!%p429_p10), 523264   ;;  %s2221_s17 = sshll.u32 (!%p429_p10), %s2657_s16, 7 }
  0x19   : > { %v2537_v0 = vld [vmem:[%s3184_s1] sm:$0xff] (!%p429_p10)   ;;  %v2538_v2 = vld [vmem:[%s3184_s1 + $0x10] sm:$0xff] (!%p429_p10)   ;;  %v2539_v3 = vld [vmem:[%s3184_s1 + $0x8] sm:$0xff] (!%p429_p10)  }
  0x1a   : > { %2293 = vmatpush3.bf16.msra.mxu0 (!%p429_p10), %v2537_v0  ;;  %2301 = vmatpush3.bf16.msra.mxu1 (!%p429_p10), %v2538_v2  ;;  %v2540_v4 = vld [vmem:[%s3184_s1 + $0x18] sm:$0xff] (!%p429_p10)   ;;  %v2541_v5 = vld [vmem:[%s3184_s1 + $0x20] sm:$0xff] (!%p429_p10)   ;;  %v2542_v6 = vld [vmem:[%s3184_s1 + $0x30] sm:$0xff] (!%p429_p10)  }
  0x1b   : > { %2294 = vmatprep.subr.bf16.mxu0 %v2667_v1  ;;  %2302 = vmatprep.subr.bf16.mxu1 %v2667_v1  ;;  %s474_s19 = scalar_select %p473_p11, %s2657_s16, 1  ;;  %v2543_v9 = vld [vmem:[%s3184_s1 + $0x28] sm:$0xff]   ;;  %v2544_v10 = vld [vmem:[%s3184_s1 + $0x38] sm:$0xff]   ;;  %v2545_v11 = vld [vmem:[%s3186_s2] sm:$0xff]  }
  0x1c   : > { %v2546_v12 = vld [vmem:[%s3186_s2 + $0x10] sm:$0xff]   ;;  %v2547_v13 = vld [vmem:[%s3186_s2 + $0x8] sm:$0xff]   ;;  %v2548_v14 = vld [vmem:[%s3186_s2 + $0x18] sm:$0xff]   ;;  %s2669_s16 = smov [#allocation5]  }
  0x1d   : > { %s2153_s20 = sshll.u32 %s474_s19, 3  ;;  %v2549_v15 = vld [vmem:[%s3186_s2 + $0x20] sm:$0xff]   ;;  %v2550_v16 = vld [vmem:[%s3186_s2 + $0x30] sm:$0xff]   ;;  %v2551_v17 = vld [vmem:[%s3186_s2 + $0x28] sm:$0xff]   ;;  %s470_s19 = sand.u32 1, %s2649_s30  }
  0x1e   : > { %2295 = vmatpush3.bf16.msra.mxu0 %v2539_v3  ;;  %2303 = vmatpush3.bf16.msra.mxu1 %v2540_v4  ;;  %s476_s26 = scalar_lea.vmem %s3185_s0, %s2153_s20  ;;  %v2552_v18 = vld [vmem:[%s3186_s2 + $0x38] sm:$0xff]   ;;  %s2152_s20 = sshll.u32 %s470_s19, 3 }
  0x1f   : > { %2308 = vmatprep.subr.bf16.mxu0 %v2667_v1  ;;  %v2832_v7 = vld [vmem:[%s476_s26] sm:$0xff]  ;;  %2316 = vmatprep.subr.bf16.mxu1 %v2667_v1  ;;  %s472_s21 = scalar_lea.vmem [#allocation5], %s2152_s20  ;;  %s3111_s2 = scalar_lea.hbm %s3173_s14, %s2221_s17 }
  0x20   : > { %v2837_v8 = vpack.c.bf16 %v2832_v7, %v2832_v7  ;;  %s2075_s26 = sshll.u32 %s472_s21, 4  ;;  %s2061_s22 = scalar_lea.sflag [#allocation6], %s470_s19  ;;  %s3113_s26 = int_to_ptr.vmem [resolvable:$true] %s2075_s26 }
  0x21   : > { %s2587_s24 = scalar_lea.vmem %s3113_s26, 128  ;;  %s2591_s20 = sshll.u32 %s2669_s16, 4  ;;  %s2592_s20 = int_to_ptr.vmem [resolvable:$false] %s2591_s20 }
  0x22   : > { %2297 = vmatmul.mubr.msk.bf16.vlgmr.msra.gmra.mrb[0].mxu0 %vm512_vm1, %v2837_v8  ;;  %2305 = vmatmul.mubr.msk.bf16.vlgmr.msra.gmra.mrb[0].mxu1 %vm512_vm1, %v2837_v8  ;;  %p2588_p12 = scmp.ne.s32.totalorder %s3113_s26, %s2587_s24  ;;  %s2593_s27 = scalar_lea.vmem %s2592_s20, 256 }
  0x23   : > { %2309 = vmatpush3.bf16.msra.mxu0 %v2541_v5  ;;  %2317 = vmatpush3.bf16.msra.mxu1 %v2542_v6  ;;  %p2594_p1 = scmp.lt.s32.totalorder %s3113_s26, %s2592_s20  ;;  %p2595_p2 = scmp.lt.s32.totalorder %s2593_s27, %s2587_s24 }
  0x24   : > { %2310 = vmatprep.subr.bf16.mxu0 %v2667_v1  ;;  %2318 = vmatprep.subr.bf16.mxu1 %v2667_v1  ;;  %p2589_p13 = pnand %p2588_p12, %p2785_p4 }
  0x25   : > { %2312 = vmatprep.mubr.msk.bf16.mxu0 %vm2668_vm0, %v2667_v1  ;;  %2320 = vmatprep.mubr.msk.bf16.mxu1 %vm2668_vm0, %v2667_v1  ;;  %p2596_p3 = por %p2595_p2, %p2594_p1 }
  0x26   : > { %p2590_p0 = pneg %p2589_p13 }
  0x27   : > { %2311 = vmatpush3.bf16.msra.mxu0 %v2543_v9  ;;  %2319 = vmatpush3.bf16.msra.mxu1 %v2544_v10 }
  0x28   : > { %2324 = vmatprep.subr.bf16.mxu0 %v2667_v1  ;;  %2332 = vmatprep.subr.bf16.mxu1 %v2667_v1  ;;  %p2597_p5 = pnand %p2596_p3, %p2590_p0 }
  0x2a   : > { %2313 = vmatmul.mubr.msk.bf16.vlgmr.msra.gmra.mrb[4].mxu0 %vm512_vm1, %v2837_v8  ;;  %2321 = vmatmul.mubr.msk.bf16.vlgmr.msra.gmra.mrb[4].mxu1 %vm512_vm1, %v2837_v8 }
  0x2b   : > { %2325 = vmatpush3.bf16.msra.mxu0 %v2545_v11  ;;  %2333 = vmatpush3.bf16.msra.mxu1 %v2546_v12 }
  0x2c   : > { %2326 = vmatprep.subr.bf16.mxu0 %v2667_v1  ;;  %2334 = vmatprep.subr.bf16.mxu1 %v2667_v1 }
  0x2d   : > { %2328 = vmatprep.mubr.msk.bf16.mxu0 %vm2668_vm0, %v2667_v1  ;;  %2336 = vmatprep.mubr.msk.bf16.mxu1 %vm2668_vm0, %v2667_v1 }
  0x2f   : > { %2327 = vmatpush3.bf16.msra.mxu0 %v2547_v13  ;;  %2335 = vmatpush3.bf16.msra.mxu1 %v2548_v14 }
  0x30   : > { %2340 = vmatprep.subr.bf16.mxu0 %v2667_v1  ;;  %2348 = vmatprep.subr.bf16.mxu1 %v2667_v1 }
  0x32   : > { %2329 = vmatmul.mubr.msk.bf16.vlgmr.msra.gmra.mrb[8].mxu0 %vm512_vm1, %v2837_v8  ;;  %2337 = vmatmul.mubr.msk.bf16.vlgmr.msra.gmra.mrb[8].mxu1 %vm512_vm1, %v2837_v8 }
  0x33   : > { %2341 = vmatpush3.bf16.msra.mxu0 %v2549_v15  ;;  %2349 = vmatpush3.bf16.msra.mxu1 %v2550_v16 }
  0x34   : > { %2342 = vmatprep.subr.bf16.mxu0 %v2667_v1  ;;  %2350 = vmatprep.subr.bf16.mxu1 %v2667_v1 }
  0x35   : > { %2344 = vmatprep.mubr.msk.bf16.mxu0 %vm2668_vm0, %v2667_v1  ;;  %2352 = vmatprep.mubr.msk.bf16.mxu1 %vm2668_vm0, %v2667_v1 }
  0x37   : > { %2343 = vmatpush3.bf16.msra.mxu0 %v2551_v17  ;;  %2351 = vmatpush3.bf16.msra.mxu1 %v2552_v18 }
  0x38   : > { %2356 = vmatprep.subr.bf16.mxu0 %v2667_v1  ;;  %2364 = vmatprep.subr.bf16.mxu1 %v2667_v1 }
  0x3a   : > { %2345 = vmatmul.mubr.msk.bf16.vlgmr.msra.gmra.mrb[12].mxu0 %vm512_vm1, %v2837_v8  ;;  %2353 = vmatmul.mubr.msk.bf16.vlgmr.msra.gmra.mrb[12].mxu1 %vm512_vm1, %v2837_v8 }
  0x3b   : > { %2360 = vmatprep.mubr.msk.bf16.mxu0 %vm2668_vm0, %v2667_v1  ;;  %2368 = vmatprep.mubr.msk.bf16.mxu1 %vm2668_vm0, %v2667_v1 }
  0x3c   : > { %2357 = vmatpush3.bf16.msra.mxu0 %v2553_v19  ;;  %2365 = vmatpush3.bf16.msra.mxu1 %v2554_v20 }
  0x3d   : > { %2358 = vmatprep.subr.bf16.mxu0 %v2667_v1  ;;  %2366 = vmatprep.subr.bf16.mxu1 %v2667_v1 }
  0x40   : > { %2359 = vmatpush3.bf16.msra.mxu0 %v2555_v21  ;;  %2367 = vmatpush3.bf16.msra.mxu1 %v2556_v22 }
  0x41   : > { %2372 = vmatprep.subr.bf16.mxu0 %v2667_v1  ;;  %2380 = vmatprep.subr.bf16.mxu1 %v2667_v1 }
  0x43   : > { %2361 = vmatmul.mubr.msk.bf16.vlgmr.msra.gmra.mrb[16].mxu0 %vm512_vm1, %v2837_v8  ;;  %2369 = vmatmul.mubr.msk.bf16.vlgmr.msra.gmra.mrb[16].mxu1 %vm512_vm1, %v2837_v8 }
  0x44   : > { %2376 = vmatprep.mubr.msk.bf16.mxu0 %vm2668_vm0, %v2667_v1  ;;  %2373 = vmatpush3.bf16.msra.mxu0 %v2557_v23 }
  0x45   : > { %2381 = vmatpush3.bf16.msra.mxu1 %v2558_v24  ;;  %2374 = vmatprep.subr.bf16.mxu0 %v2667_v1 }
  0x46   : > { %2382 = vmatprep.subr.bf16.mxu1 %v2667_v1  ;;  %2384 = vmatprep.mubr.msk.bf16.mxu1 %vm2668_vm0, %v2667_v1 }
  0x48   : > { %2375 = vmatpush3.bf16.msra.mxu0 %v2559_v25 }
  0x49   : > { %2383 = vmatpush3.bf16.msra.mxu1 %v2560_v26  ;;  %2388 = vmatprep.subr.bf16.mxu0 %v2667_v1 }
  0x4a   : > { %2394 = vmatprep.subr.bf16.mxu1 %v2667_v1 }
  0x4b   : > { %2377 = vmatmul.mubr.msk.bf16.vlgmr.msra.gmra.mrb[20].mxu0 %vm512_vm1, %v2837_v8 }
  0x4c   : > { %2385 = vmatmul.mubr.msk.bf16.vlgmr.msra.gmra.mrb[20].mxu1 %vm512_vm1, %v2837_v8  ;;  %2390 = vmatprep.mubr.msk.bf16.mxu0 %vm2668_vm0, %v2667_v1 }
  0x4d   : > { %2396 = vmatprep.mubr.msk.bf16.mxu1 %vm2668_vm0, %v2667_v1 }
  0xf5   : > { %v550_v27 = vpop.f32.mrb[0].mxu0  ;;  %v602_v28 = vpop.f32.mrb[0].mxu1 }
  0xf6   : > { %v1160_v29 = vmul.f32 0.35355338, %v550_v27  ;;  %v2298_v30 = vpop.f32.mrb[1].mxu0  ;;  %v1161_v31 = vmul.f32 0.35355338, %v602_v28  ;;  %v2306_v32 = vpop.f32.mrb[1].mxu1 }
  0xf7   : > { %v553_v33 = vpop.f32.mrb[2].mxu0  ;;  %v605_v34 = vpop.f32.mrb[2].mxu1 }
  0xf8   : > { %v1164_v35 = vpack.c.bf16 %v1160_v29, %v1160_v29  ;;  %v1165_v36 = vpack.c.bf16 %v1161_v31, %v1161_v31  ;;  %v2299_v37 = vpop.f32.mrb[3].mxu0  ;;  %v2307_v38 = vpop.f32.mrb[3].mxu1 }
  0xfa   : > { %1169 = vst.msk [vmem:[#allocation2] sm:$0xf] %vm1168_vm2, %v1164_v35  ;;  %1170 = vst.msk [vmem:[#allocation2 + $0x4] sm:$0xf] %vm1168_vm2, %v1165_v36 }
  0xfd   : > { %v654_v39 = vpop.f32.mrb[4].mxu0  ;;  %v706_v40 = vpop.f32.mrb[4].mxu1 }
  0xfe   : > { %v1162_v41 = vmul.f32 0.35355338, %v654_v39  ;;  %v2314_v42 = vpop.f32.mrb[5].mxu0  ;;  %v1163_v43 = vmul.f32 0.35355338, %v706_v40  ;;  %v2322_v44 = vpop.f32.mrb[5].mxu1 }
  0xff   : > { %v657_v45 = vpop.f32.mrb[6].mxu0  ;;  %v709_v46 = vpop.f32.mrb[6].mxu1 }
 0x100   : > { %v1166_v47 = vpack.c.bf16 %v1162_v41, %v1162_v41  ;;  %v1167_v48 = vpack.c.bf16 %v1163_v43, %v1163_v43  ;;  %v2315_v49 = vpop.f32.mrb[7].mxu0  ;;  %v2323_v50 = vpop.f32.mrb[7].mxu1  ;;  %v1389_v45 = vlaneseq }
 0x101   : > { %v1196_v13 = vld [vmem:[#allocation2] sm:$0xf]  ;;  %v1197_v14 = vld [vmem:[#allocation2 + $0x4] sm:$0xf] }
 0x102   : > { %1171 = vst.msk [vmem:[#allocation2 + $0x8] sm:$0xf] %vm1168_vm2, %v1166_v47  ;;  %1172 = vst.msk [vmem:[#allocation2 + $0xc] sm:$0xf] %vm1168_vm2, %v1167_v48  ;;  %v1390_v46 = vshrl.u32 %v1389_v45, 7  ;;  %v1394_v47 = vand.u32 127, %v1389_v45 }
 0x104   : > { %vm1395_vm5 = vcmp.le.s32.totalorder %v1394_v47, %v1390_v46 }
 0x105   : > { %v774_v51 = vpop.f32.mrb[8].mxu0  ;;  %v826_v52 = vpop.f32.mrb[8].mxu1 }
 0x106   : > { %v1173_v53 = vpack.c.bf16 %v774_v51, %v774_v51  ;;  %v1174_v54 = vpack.c.bf16 %v826_v52, %v826_v52  ;;  %v2330_v55 = vpop.f32.mrb[9].mxu0  ;;  %v2338_v56 = vpop.f32.mrb[9].mxu1 }
 0x107   : > { %v777_v57 = vpop.f32.mrb[10].mxu0  ;;  %v829_v58 = vpop.f32.mrb[10].mxu1 }
 0x108   : > { %1177 = vst.msk [vmem:[#allocation3] sm:$0xf] %vm1168_vm2, %v1173_v53  ;;  %1178 = vst.msk [vmem:[#allocation3 + $0x4] sm:$0xf] %vm1168_vm2, %v1174_v54  ;;  %v2331_v59 = vpop.f32.mrb[11].mxu0  ;;  %v2339_v60 = vpop.f32.mrb[11].mxu1 }
 0x109   : > { %v1198_v19 = vld [vmem:[#allocation2 + $0x8] sm:$0xf]  ;;  %v1199_v20 = vld [vmem:[#allocation2 + $0xc] sm:$0xf] }
 0x10d   : > { %v878_v61 = vpop.f32.mrb[12].mxu0  ;;  %v930_v62 = vpop.f32.mrb[12].mxu1 }
 0x10e   : > { %v1175_v63 = vpack.c.bf16 %v878_v61, %v878_v61  ;;  %v1176_v0 = vpack.c.bf16 %v930_v62, %v930_v62  ;;  %v2346_v2 = vpop.f32.mrb[13].mxu0  ;;  %v2354_v3 = vpop.f32.mrb[13].mxu1 }
 0x10f   : > { %v881_v4 = vpop.f32.mrb[14].mxu0  ;;  %v933_v5 = vpop.f32.mrb[14].mxu1  ;;  %v1200_v6 = vld [vmem:[#allocation3] sm:$0xf]  ;;  %v1201_v8 = vld [vmem:[#allocation3 + $0x4] sm:$0xf] }
 0x110   : > { %1179 = vst.msk [vmem:[#allocation3 + $0x8] sm:$0xf] %vm1168_vm2, %v1175_v63  ;;  %1180 = vst.msk [vmem:[#allocation3 + $0xc] sm:$0xf] %vm1168_vm2, %v1176_v0  ;;  %v2347_v9 = vpop.f32.mrb[15].mxu0  ;;  %v2355_v10 = vpop.f32.mrb[15].mxu1 }
 0x111   : > { %v1209_v11 = vsel %vm1204_vm3, %v1200_v6, 0  ;;  %v1255_v12 = vsel %vm1204_vm3, %v1201_v8, 0 }
 0x112   : > { %2389 = vmatpush3.bf16.xpose.msra.mxu0 %v1209_v11  ;;  %2395 = vmatpush3.bf16.xpose.msra.mxu1 %v1255_v12 }
 0x113   : > { %2400 = vmatprep.subr.bf16.mxu0 %v2667_v1  ;;  %2406 = vmatprep.subr.bf16.mxu1 %v2667_v1 }
 0x116   : > { %v998_v21 = vpop.f32.mrb[16].mxu0  ;;  %v1050_v25 = vpop.f32.mrb[16].mxu1 }
 0x117   : > { %v1202_v15 = vld [vmem:[#allocation3 + $0x8] sm:$0xf]  ;;  %v1203_v16 = vld [vmem:[#allocation3 + $0xc] sm:$0xf]  ;;  %v1181_v22 = vpack.c.bf16 %v998_v21, %v998_v21  ;;  %v2362_v23 = vpop.f32.mrb[17].mxu0  ;;  %v1182_v27 = vpack.c.bf16 %v1050_v25, %v1050_v25  ;;  %v2370_v28 = vpop.f32.mrb[17].mxu1 }
 0x118   : > { %v1301_v17 = vsel %vm1204_vm3, %v1202_v15, 0  ;;  %v1347_v18 = vsel %vm1204_vm3, %v1203_v16, 0  ;;  %v1001_v24 = vpop.f32.mrb[18].mxu0  ;;  %v1053_v29 = vpop.f32.mrb[18].mxu1 }
 0x119   : > { %2391 = vmatmul.mubr.msk.bf16.vlgmr.msra.gmra.mrb[24].mxu0 %vm1204_vm3, %v1196_v13  ;;  %2397 = vmatmul.mubr.msk.bf16.vlgmr.msra.gmra.mrb[24].mxu1 %vm1204_vm3, %v1197_v14  ;;  %1185 = vst.msk [vmem:[#allocation4] sm:$0xf] %vm1168_vm2, %v1181_v22  ;;  %v2363_v26 = vpop.f32.mrb[19].mxu0  ;;  %1186 = vst.msk [vmem:[#allocation4 + $0x4] sm:$0xf] %vm1168_vm2, %v1182_v27  ;;  %v2371_v30 = vpop.f32.mrb[19].mxu1 }
 0x11a   : > { %2401 = vmatpush3.bf16.xpose.msra.mxu0 %v1301_v17  ;;  %2407 = vmatpush3.bf16.xpose.msra.mxu1 %v1347_v18 }
 0x11b   : > { %2402 = vmatprep.mubr.msk.bf16.mxu0 %vm2668_vm0, %v2667_v1  ;;  %2408 = vmatprep.mubr.msk.bf16.mxu1 %vm2668_vm0, %v2667_v1 }
 0x11c   : > { %2412 = vmatprep.subr.bf16.mxu0 %v2667_v1  ;;  %2418 = vmatprep.subr.bf16.mxu1 %v2667_v1 }
 0x11e   : > { %v1102_v31 = vpop.f32.mrb[20].mxu0 }
 0x11f   : > { %v1154_v33 = vpop.f32.mrb[20].mxu1  ;;  %v1183_v34 = vpack.c.bf16 %v1102_v31, %v1102_v31  ;;  %v2378_v35 = vpop.f32.mrb[21].mxu0 }
 0x120   : > { %v1450_v32 = vld [vmem:[#allocation4] sm:$0xf]  ;;  %v1184_v37 = vpack.c.bf16 %v1154_v33, %v1154_v33  ;;  %v2386_v38 = vpop.f32.mrb[21].mxu1  ;;  %v1105_v39 = vpop.f32.mrb[22].mxu0  ;;  %v1451_v41 = vld [vmem:[#allocation4 + $0x4] sm:$0xf] }
 0x121   : > { %2403 = vmatmul.mubr.msk.bf16.vlgmr.msra.gmra.mrb[28].mxu0 %vm1204_vm3, %v1198_v19  ;;  %2409 = vmatmul.mubr.msk.bf16.vlgmr.msra.gmra.mrb[28].mxu1 %vm1204_vm3, %v1199_v20  ;;  %v1459_v36 = vsel %vm1457_vm4, %v1450_v32, 0  ;;  %v1157_v40 = vpop.f32.mrb[22].mxu1  ;;  %1187 = vst.msk [vmem:[#allocation4 + $0x8] sm:$0xf] %vm1168_vm2, %v1183_v34  ;;  %v2379_v42 = vpop.f32.mrb[23].mxu0  ;;  %v1505_v43 = vsel %vm1457_vm4, %v1451_v41, 0 }
 0x122   : > { %2414 = vmatprep.mubr.msk.bf16.mxu0 %vm2668_vm0, %v2667_v1  ;;  %2420 = vmatprep.mubr.msk.bf16.mxu1 %vm2668_vm0, %v2667_v1  ;;  %1188 = vst.msk [vmem:[#allocation4 + $0xc] sm:$0xf] %vm1168_vm2, %v1184_v37  ;;  %v2387_v44 = vpop.f32.mrb[23].mxu1 }
 0x123   : > { %2413 = vmatpush3.bf16.msra.mxu0 %v1459_v36  ;;  %2419 = vmatpush3.bf16.msra.mxu1 %v1505_v43  ;;  %v1650_v44 = vld [vmem:[%s3163_s4] sm:$0xf] }
 0x124   : > { %2424 = vmatprep.subr.bf16.mxu0 %v2667_v1  ;;  %2430 = vmatprep.subr.bf16.mxu1 %v2667_v1 }
 0x128   : > { %v1452_v36 = vld [vmem:[#allocation4 + $0x8] sm:$0xf] }
 0x129   : > { %v1551_v40 = vsel %vm1457_vm4, %v1452_v36, 0  ;;  %v1453_v41 = vld [vmem:[#allocation4 + $0xc] sm:$0xf] }
 0x12a   : > { %v1597_v46 = vsel %vm1457_vm4, %v1453_v41, 0 }
 0x1ec   : > { %v1245_v48 = vpop.f32.mrb[24].mxu0  ;;  %v1291_v49 = vpop.f32.mrb[24].mxu1 }
 0x1ed   : > { %v1398_v50 = vsel %vm1395_vm5, %v1245_v48, -inf  ;;  %v2392_v51 = vpop.f32.mrb[25].mxu0  ;;  %v2398_v52 = vpop.f32.mrb[25].mxu1  ;;  %v1399_v56 = vsel %vm1395_vm5, %v1291_v49, -inf  ;;  %v1655_v48 = vsel %vm1457_vm4, %v1650_v44, 0  ;;  %v2561_v44 = vld [vmem:[%s3165_s6] sm:$0xff]  }
 0x1ee   : > { %v1248_v53 = vpop.f32.mrb[26].mxu0  ;;  %v1294_v54 = vpop.f32.mrb[26].mxu1  ;;  %v1402_v55 = vsel %vm1204_vm3, %v1398_v50, -inf  ;;  %v1405_v59 = vsel %vm1204_vm3, %v1399_v56, -inf  ;;  %v2200_v52 = vld [vmem:[%s3163_s4 + $0x4] sm:$0xf] }
 0x1ef   : > { %v2399_v57 = vpop.f32.mrb[27].mxu1  ;;  %1403 = vmax.xlane.f32.xlu0 %v1402_v55  ;;  %v2393_v58 = vpop.f32.mrb[27].mxu0  ;;  %v1704_v53 = vsel %vm1457_vm4, %v2200_v52, 0  ;;  %v2202_v54 = vld [vmem:[%s3163_s4 + $0x8] sm:$0xf] }
 0x1f0   : > { %v1753_v58 = vsel %vm1457_vm4, %v2202_v54, 0 }
 0x1f3   : > { %1406 = vmax.xlane.f32.xlu0 %v1405_v59 }
 0x1f4   : > { %v1337_v60 = vpop.f32.mrb[28].mxu0  ;;  %v1383_v61 = vpop.f32.mrb[28].mxu1 }
 0x1f5   : > { %v1400_v62 = vsel %vm1395_vm5, %v1337_v60, -inf  ;;  %v2404_v63 = vpop.f32.mrb[29].mxu0  ;;  %v2410_v0 = vpop.f32.mrb[29].mxu1  ;;  %v1401_v5 = vsel %vm1395_vm5, %v1383_v61, -inf  ;;  %v2204_v60 = vld [vmem:[%s3163_s4 + $0xc] sm:$0xf] }
 0x1f6   : > { %v1340_v2 = vpop.f32.mrb[30].mxu0  ;;  %v1386_v3 = vpop.f32.mrb[30].mxu1  ;;  %v1408_v4 = vsel %vm1204_vm3, %v1400_v62, -inf  ;;  %v1411_v9 = vsel %vm1204_vm3, %v1401_v5, -inf }
 0x1f7   : > { %v2411_v6 = vpop.f32.mrb[31].mxu1  ;;  %1409 = vmax.xlane.f32.xlu1 %v1408_v4  ;;  %v2405_v8 = vpop.f32.mrb[31].mxu0  ;;  %v1802_v2 = vsel %vm1457_vm4, %v2204_v60, 0 }
 0x1fb   : > { %1412 = vmax.xlane.f32.xlu1 %v1411_v9 }
 0x27c   : > { %v1404_v10 = vpop.xlane.xlu0 %1403 }
 0x27d   : > { %v1414_v11 = vsub.f32 %v1398_v50, %v1404_v10 }
 0x27f   : > { %v1418_v12 = vmul.f32 1.442695, %v1414_v11 }
 0x280   : > { %v1407_v13 = vpop.xlane.xlu0 %1406 }
 0x281   : > { %2567 = vpow2.f32 %v1418_v12  ;;  %v1415_v14 = vsub.f32 %v1399_v56, %v1407_v13 }
 0x283   : > { %v1420_v15 = vmul.f32 1.442695, %v1415_v14 }
 0x284   : > { %v1410_v16 = vpop.xlane.xlu1 %1409 }
 0x285   : > { %2569 = vpow2.f32 %v1420_v15  ;;  %v1416_v17 = vsub.f32 %v1400_v62, %v1410_v16  ;;  %v2198_v16 = vld [vmem:[%s3164_s5] ss:$0 sm:$0xff] }
 0x287   : > { %v1422_v18 = vmul.f32 1.442695, %v1416_v17 }
 0x288   : > { %v1413_v19 = vpop.xlane.xlu1 %1412 }
 0x289   : > { %2571 = vpow2.f32 %v1422_v18  ;;  %v1417_v20 = vsub.f32 %v1401_v5, %v1413_v19 }
 0x28b   : > { %v2568_v21 = vpop.eup %2567  ;;  %v1424_v22 = vmul.f32 1.442695, %v1417_v20 }
 0x28c   : > { %v1426_v23 = vsel %vm1204_vm3, %v2568_v21, 0.0 }
 0x28d   : > { %2573 = vpow2.f32 %v1424_v22  ;;  %1427 = vadd.xlane.f32.xlu0 %v1426_v23 }
 0x28f   : > { %v2570_v24 = vpop.eup %2569 }
 0x290   : > { %v1429_v25 = vsel %vm1204_vm3, %v2570_v24, 0.0 }
 0x291   : > { %1430 = vadd.xlane.f32.xlu1 %v1429_v25 }
 0x293   : > { %v2572_v26 = vpop.eup %2571 }
 0x294   : > { %v1432_v27 = vsel %vm1204_vm3, %v2572_v26, 0.0 }
 0x295   : > { %1433 = vadd.xlane.f32.xlu0 %v1432_v27 }
 0x297   : > { %v2574_v28 = vpop.eup %2573 }
 0x298   : > { %v1435_v29 = vsel %vm1204_vm3, %v2574_v28, 0.0 }
 0x299   : > { %1436 = vadd.xlane.f32.xlu1 %v1435_v29 }
 0x31a   : > { %v1428_v30 = vpop.xlane.xlu0 %1427 }
 0x31b   : > { %2575 = vrcp.f32 %v1428_v30 }
 0x31e   : > { %v1431_v31 = vpop.xlane.xlu1 %1430 }
 0x31f   : > { %2577 = vrcp.f32 %v1431_v31 }
 0x322   : > { %v1434_v32 = vpop.xlane.xlu0 %1433 }
 0x323   : > { %2579 = vrcp.f32 %v1434_v32 }
 0x325   : > { %v2576_v33 = vpop.eup %2575 }
 0x326   : > { %v1442_v34 = vmul.f32 %v2576_v33, %v2568_v21  ;;  %v1437_v35 = vpop.xlane.xlu1 %1436 }
 0x327   : > { %2581 = vrcp.f32 %v1437_v35 }
 0x328   : > { %v1446_v37 = vpack.c.bf16 %v1442_v34, %v1442_v34 }
 0x329   : > { %v2578_v38 = vpop.eup %2577 }
 0x32a   : > { %v1443_v39 = vmul.f32 %v2578_v38, %v2570_v24  ;;  %2415 = vmatmul.mubr.msk.bf16.vlgmr.msra.gmra.mrb[32].mxu0 %vm1204_vm3, %v1446_v37 }
 0x32b   : > { %2425 = vmatpush3.bf16.msra.mxu0 %v1551_v40  ;;  %2426 = vmatprep.mubr.msk.bf16.mxu0 %vm2668_vm0, %v2667_v1 }
 0x32c   : > { %v1447_v42 = vpack.c.bf16 %v1443_v39, %v1443_v39  ;;  %2436 = vmatprep.subr.bf16.mxu0 %v2667_v1 }
 0x32d   : > { %v2580_v43 = vpop.eup %2579 }
 0x32e   : > { %v1444_v45 = vmul.f32 %v2580_v43, %v2572_v26  ;;  %2421 = vmatmul.mubr.msk.bf16.vlgmr.msra.gmra.mrb[32].mxu1 %vm1204_vm3, %v1447_v42 }
 0x32f   : > { %2431 = vmatpush3.bf16.msra.mxu1 %v1597_v46  ;;  %2432 = vmatprep.mubr.msk.bf16.mxu1 %vm2668_vm0, %v2667_v1  ;;  %v2564_v46 = vld [vmem:[%s3167_s8 + $0x8] sm:$0xff]  }
 0x330   : > { %v1448_v47 = vpack.c.bf16 %v1444_v45, %v1444_v45  ;;  %2442 = vmatprep.subr.bf16.mxu1 %v2667_v1  ;;  %v2562_v45 = vld [vmem:[%s3165_s6 + $0x8] sm:$0xff]  }
 0x331   : > { %v2582_v49 = vpop.eup %2581 }
 0x332   : > { %v1445_v50 = vmul.f32 %v2582_v49, %v2574_v28  ;;  %2427 = vmatmul.mubr.msk.bf16.vlgmr.msra.gmra.mrb[36].mxu0 %vm1204_vm3, %v1448_v47 }
 0x333   : > { %2437 = vmatpush3.bf16.msra.mxu0 %v1655_v48  ;;  %2438 = vmatprep.mubr.msk.bf16.mxu0 %vm2668_vm0, %v2667_v1 }
 0x334   : > { %v1449_v51 = vpack.c.bf16 %v1445_v50, %v1445_v50  ;;  %2448 = vmatprep.subr.bf16.mxu0 %v2667_v1 }
 0x336   : > { %2433 = vmatmul.mubr.msk.bf16.vlgmr.msra.gmra.mrb[36].mxu1 %vm1204_vm3, %v1449_v51  ;;  %v2206_v51 = vld [vmem:[%s3169_s10] ss:$0 sm:$0xff] }
 0x337   : > { %2444 = vmatprep.mubr.msk.bf16.mxu1 %vm2668_vm0, %v2667_v1  ;;  %2443 = vmatpush3.bf16.msra.mxu1 %v1704_v53  ;;  %v2207_v53 = vld [vmem:[%s3170_s11] ss:$0 sm:$0xff] }
 0x338   : > { %2454 = vmatprep.subr.bf16.mxu1 %v2667_v1 }
 0x3fd   : > { %v1495_v55 = vpop.f32.mrb[32].mxu0 }
 0x3fe   : > { %v1639_v56 = vpack.c.bf16 %v1495_v55, %v1495_v55  ;;  %v2416_v57 = vpop.f32.mrb[33].mxu0 }
 0x3ff   : > { %v1498_v59 = vpop.f32.mrb[34].mxu0  ;;  %v2565_v57 = vld [vmem:[%s3167_s8 + $0x10] sm:$0xff]  }
 0x400   : > { %v2417_v61 = vpop.f32.mrb[35].mxu0  ;;  %2439 = vmatmul.mubr.msk.bf16.vlgmr.msra.gmra.mrb[40].mxu0 %vm1204_vm3, %v1639_v56  ;;  %v2208_v59 = vld [vmem:[%s3166_s7] ss:$0 sm:$0xff] }
 0x401   : > { %v1541_v62 = vpop.f32.mrb[32].mxu1  ;;  %2449 = vmatpush3.bf16.msra.mxu0 %v1753_v58  ;;  %2450 = vmatprep.mubr.msk.bf16.mxu0 %vm2668_vm0, %v2667_v1  ;;  %v2566_v58 = vld [vmem:[%s3167_s8 + $0x18] sm:$0xff]  }
 0x402   : > { %v1640_v63 = vpack.c.bf16 %v1541_v62, %v1541_v62  ;;  %v2422_v0 = vpop.f32.mrb[33].mxu1  ;;  %2460 = vmatprep.subr.bf16.mxu0 %v2667_v1 }
 0x403   : > { %v1544_v3 = vpop.f32.mrb[34].mxu1 }
 0x404   : > { %v2423_v4 = vpop.f32.mrb[35].mxu1  ;;  %2445 = vmatmul.mubr.msk.bf16.vlgmr.msra.gmra.mrb[40].mxu1 %vm1204_vm3, %v1640_v63 }
 0x405   : > { %v1587_v5 = vpop.f32.mrb[36].mxu0  ;;  %2455 = vmatpush3.bf16.msra.mxu1 %v1802_v2  ;;  %2456 = vmatprep.mubr.msk.bf16.mxu1 %vm2668_vm0, %v2667_v1 }
 0x406   : > { %v1641_v6 = vpack.c.bf16 %v1587_v5, %v1587_v5  ;;  %v2428_v8 = vpop.f32.mrb[37].mxu0  ;;  %2468 = vmatprep.subr.bf16.mxu1 %v2667_v1 }
 0x407   : > { %v1590_v9 = vpop.f32.mrb[38].mxu0 }
 0x408   : > { %v2429_v10 = vpop.f32.mrb[39].mxu0  ;;  %2451 = vmatmul.mubr.msk.bf16.vlgmr.msra.gmra.mrb[44].mxu0 %vm1204_vm3, %v1641_v6 }
 0x409   : > { %v1633_v11 = vpop.f32.mrb[36].mxu1  ;;  %2464 = vmatprep.mubr.msk.bf16.mxu0 %vm2668_vm0, %v2667_v1  ;;  %2461 = vmatpush3.bf16.msra.mxu0 %v2561_v44 }
 0x40a   : > { %v1642_v12 = vpack.c.bf16 %v1633_v11, %v1633_v11  ;;  %v2434_v13 = vpop.f32.mrb[37].mxu1  ;;  %2462 = vmatprep.subr.bf16.mxu0 %v2667_v1 }
 0x40b   : > { %v1636_v14 = vpop.f32.mrb[38].mxu1 }
 0x40c   : > { %v2435_v15 = vpop.f32.mrb[39].mxu1  ;;  %2457 = vmatmul.mubr.msk.bf16.vlgmr.msra.gmra.mrb[44].mxu1 %vm1204_vm3, %v1642_v12 }
 0x40d   : > { %2476 = vmatprep.mubr.msk.bf16.mxu1 %vm2668_vm0, %v2667_v1  ;;  %2463 = vmatpush3.bf16.msra.mxu0 %v2562_v45 }
 0x4d3   : > { %v1691_v17 = vpop.f32.mrb[40].mxu0 }
 0x4d4   : > { %v2440_v18 = vpop.f32.mrb[41].mxu0  ;;  %v1697_v20 = vadd.f32 %v2198_v16, %v1691_v17 }
 0x4d5   : > { %v1694_v19 = vpop.f32.mrb[42].mxu0 }
 0x4d6   : > { %v2441_v21 = vpop.f32.mrb[43].mxu0 }
 0x4d7   : > { %v1740_v22 = vpop.f32.mrb[40].mxu1  ;;  %v2218_v21 = vld [vmem:[%s3171_s12] ss:$0 sm:$0xff] }
 0x4d8   : > { %v1746_v23 = vadd.f32 %v1740_v22, %v1697_v20  ;;  %v2446_v24 = vpop.f32.mrb[41].mxu1 }
 0x4d9   : > { %v1743_v25 = vpop.f32.mrb[42].mxu1 }
 0x4da   : > { %v2447_v26 = vpop.f32.mrb[43].mxu1 }
 0x4db   : > { %v1789_v27 = vpop.f32.mrb[44].mxu0 }
 0x4dc   : > { %v1795_v28 = vadd.f32 %v1789_v27, %v1746_v23  ;;  %v2452_v29 = vpop.f32.mrb[45].mxu0  ;;  %v2219_v23 = vld [vmem:[%s3172_s13] ss:$0 sm:$0xff] }
 0x4dd   : > { %v1792_v30 = vpop.f32.mrb[46].mxu0 }
 0x4de   : > { %v2453_v31 = vpop.f32.mrb[47].mxu0 }
 0x4df   : > { %v1838_v32 = vpop.f32.mrb[44].mxu1 }
 0x4e0   : > { %v1844_v33 = vadd.f32 %v1838_v32, %v1795_v28  ;;  %v2458_v34 = vpop.f32.mrb[45].mxu1 }
 0x4e1   : > { %v1841_v35 = vpop.f32.mrb[46].mxu1 }
 0x4e2   : > { %v2459_v36 = vpop.f32.mrb[47].mxu1  ;;  %v1845_v37 = vadd.f32 %v1844_v33, %v2832_v7  ;;  %v2563_v7 = vld [vmem:[%s3167_s8] sm:$0xff]  }
 0x4e3   : > { %2469 = vmatpush3.bf16.msra.mxu1 %v2563_v7 }
 0x4e4   : > { %v1849_v38 = vsel %vm512_vm1, %v1845_v37, 0.0  ;;  %2470 = vmatprep.subr.bf16.mxu1 %v2667_v1 }
 0x4e5   : > { %1850 = vadd.xlane.f32.xlu0 %v1849_v38 }
 0x4e7   : > { %2471 = vmatpush3.bf16.msra.mxu1 %v2564_v46 }
 0x4e8   : > { %2472 = vmatprep.subr.bf16.mxu1 %v2667_v1 }
 0x4eb   : > { %2473 = vmatpush3.bf16.msra.mxu1 %v2565_v57 }
 0x4ec   : > { %2474 = vmatprep.subr.bf16.mxu1 %v2667_v1  ;;  %v2212_v1 = vld [vmem:[%s3168_s9] ss:$0 sm:$0xff] }
 0x4ef   : > { %2475 = vmatpush3.bf16.msra.mxu1 %v2566_v58 }
 0x572   : > { %v1851_v39 = vpop.xlane.xlu0 %1850 }
 0x573   : > { %v1853_v40 = vmul.f32 0.03125, %v1851_v39 }
 0x575   : > { %v1854_v41 = vsub.f32 %v1845_v37, %v1853_v40 }
 0x577   : > { %v1855_v42 = vmul.f32 %v1854_v41, %v1854_v41 }
 0x579   : > { %v1856_v43 = vsel %vm512_vm1, %v1855_v42, 0.0 }
 0x57a   : > { %1857 = vadd.xlane.f32.xlu1 %v1856_v43 }
 0x607   : > { %v1858_v47 = vpop.xlane.xlu1 %1857 }
 0x608   : > { %v1859_v48 = vmul.f32 0.03125, %v1858_v47 }
 0x60a   : > { %v1860_v49 = vadd.f32 1e-05, %v1859_v48 }
 0x60c   : > { %2583 = vrsqrt.f32 %v1860_v49 }
 0x616   : > { %v2584_v50 = vpop.eup %2583 }
 0x617   : > { %v1862_v52 = vmul.f32 %v2584_v50, %v1854_v41 }
 0x619   : > { %v1869_v54 = vmul.f32 %v2206_v51, %v1862_v52 }
 0x61b   : > { %v1876_v55 = vadd.f32 %v2207_v53, %v1869_v54 }
 0x61d   : > { %v1877_v56 = vpack.c.bf16 %v1876_v55, %v1876_v55 }
 0x61f   : > { %2465 = vmatmul.mubr.msk.bf16.vlgmr.msra.gmra.mrb[48].mxu0 %vm512_vm1, %v1877_v56 }
 0x6f2   : > { %v1938_v60 = vpop.f32.mrb[48].mxu0 }
 0x6f3   : > { %v1939_v61 = vadd.f32 %v2208_v59, %v1938_v60  ;;  %v2466_v62 = vpop.f32.mrb[49].mxu0 }
 0x6f4   : > { %v1941_v63 = vpop.f32.mrb[50].mxu0 }
 0x6f5   : > { %v1944_v0 = vmax.f32 %v1939_v61, 0.0  ;;  %v2467_v2 = vpop.f32.mrb[51].mxu0 }
 0x6f7   : > { %v1945_v3 = vpack.c.bf16 %v1944_v0, %v1944_v0 }
 0x6f9   : > { %2477 = vmatmul.mubr.msk.bf16.vlgmr.msra.gmra.mrb[48].mxu1 %vm1985_vm6, %v1945_v3 }
 0x7cc   : > { %v2023_v4 = vpop.f32.mrb[48].mxu1 }
 0x7cd   : > { %v2024_v5 = vadd.f32 %v2212_v1, %v2023_v4  ;;  %v2478_v6 = vpop.f32.mrb[49].mxu1 }
 0x7ce   : > { %v2026_v8 = vpop.f32.mrb[50].mxu1 }
 0x7cf   : > { %v2479_v9 = vpop.f32.mrb[51].mxu1  ;;  %v2029_v10 = vadd.f32 %v2024_v5, %v1876_v55 }
 0x7d1   : > { %v2032_v11 = vsel %vm512_vm1, %v2029_v10, 0.0 }
 0x7d2   : > { %2033 = vadd.xlane.f32.xlu0 %v2032_v11 }
 0x85f   : > { %v2034_v12 = vpop.xlane.xlu0 %2033 }
 0x860   : > { %v2035_v13 = vmul.f32 0.03125, %v2034_v12 }
 0x862   : > { %v2036_v14 = vsub.f32 %v2029_v10, %v2035_v13 }
 0x864   : > { %v2037_v15 = vmul.f32 %v2036_v14, %v2036_v14 }
 0x866   : > { %v2038_v16 = vsel %vm512_vm1, %v2037_v15, 0.0 }
 0x867   : > { %2039 = vadd.xlane.f32.xlu1 %v2038_v16 }
 0x8f4   : > { %v2040_v17 = vpop.xlane.xlu1 %2039 }
 0x8f5   : > { %v2041_v18 = vmul.f32 0.03125, %v2040_v17 }
 0x8f7   : > { %v2042_v19 = vadd.f32 1e-05, %v2041_v18 }
 0x8f9   : > { %2585 = vrsqrt.f32 %v2042_v19 }
 0x903   : > { %v2586_v20 = vpop.eup %2585 }
 0x904   : > { %v2044_v22 = vmul.f32 %v2586_v20, %v2036_v14 }
 0x906   : > { %v2051_v24 = vmul.f32 %v2218_v21, %v2044_v22 }
 0x908   : > { %v2058_v25 = vadd.f32 %v2219_v23, %v2051_v24 }
 0x90a   : > { %2059 = vst.msk [vmem:[%s472_s21] sm:$0xff] %vm512_vm1, %v2058_v25 }
 0x90b   : > { %2600 = shalt.err (!%p2597_p5)
}
 0x90c   : > { %s2601_s0 = scalar_lea.hbm %s3111_s2, 128  ;;  %s2605_s28 = scalar_lea.hbm %s3173_s14, 256 }
 0x90d   : > { %p2602_p6 = scmp.ne.s32.totalorder %s3111_s2, %s2601_s0  ;;  %p2606_p10 = scmp.lt.u32.totalorder %s3111_s2, %s3173_s14 }
 0x90e   : > { %p2607_p11 = scmp.lt.u32.totalorder %s2605_s28, %s2601_s0  ;;  %p2609_p13 = scmp.lt.u32.totalorder %s2601_s0, %s3111_s2 }
 0x90f   : > { %p2603_p7 = pnand %p2602_p6, %p2785_p4 }
 0x910   : > { %p2608_p12 = por %p2607_p11, %p2606_p10 }
 0x911   : > { %p2604_p9 = pneg %p2603_p7 }
 0x912   : > { %p2610_p0 = por %p2609_p13, %p2608_p12 }
 0x914   : > { %p2611_p1 = pnand %p2610_p0, %p2604_p9 }
 0x916   : > { %2614 = shalt.err (!%p2611_p1)
}
 0x917   : > { %2480 = dma.vmem_to_hbm [thread:$0]  (%p2785_p4), %s3113_s26, 128, %s3111_s2, %s2061_s22  }
 0x918 PF: > { %p2486_p2 = scmp.ge.s32.totalorder %s2665_s18, 2  ;;  %s2087_s24 = sand.u32 1, %s2645_s29  }
 0x919   : > { %s2088_s16 = scalar_lea.sflag [#allocation6], %s2087_s24 }
 0x91a   : > { %p2483_p3 = pnand %p2486_p2, %p2792_p8 }
 0x91c   : > { %2640 = dma.done.wait (!%p2483_p3), %s2088_s16, 128  }
 0x91d   : > { %2642 = vsyncadd (!%p2483_p3), %s2088_s16, 4294967168  ;;  %s27_s18 = sadd.s32 1, %s2665_s18   ;;  %s3187_s23 = sld [smem:[#allocation10_spill]] }
 0x91e   : > { %p24_p5 = scmp.ge.s32.totalorder %s27_s18, 4   ;;  %s3188_s16 = sld [smem:[#allocation8_spill]] }
 0x91f   : > { %s3189_s17 = sld [smem:[#allocation9_spill]]  ;;  %s3190_s29 = smov %s2649_s30 }
 0x920   : > { %s3191_s30 = smov %s2653_s15  ;;  %26 = sbr.rel (!%p24_p5) target bundleno = 8 (0x8), region = 120 }
 0x923   : > { %s3192_s15 = smov %s3187_s23 }
 0x927   :  { %2093 = vsyncpa [#allocation6], 1 }
 0x928   :  { %2095 = vsyncpa [#allocation6 + $0x1], 1 }

</bundles_post_ra>
